<compile_context>
chip_gen: v6e
topology: v6e:2x2x1
jax: 0.10.0
libtpu: 0.0.40
codegen_flags: <defaults>
</compile_context>

<pallas_src>
import jax
import jax.numpy as jnp
import numpy as np
from jax.experimental import pallas as pl
from jax.experimental.pallas import tpu as pltpu

KH = KW = 2
H = W = 6
CIN = 3
C1 = 4                      # conv1 out channels
C2 = 5                      # conv2 out channels
KE = KH + KH - 1            # 3  (effective composed kernel size)
H2 = W2 = H - KE + 1        # 4  (final spatial size)
P2 = H2 * W2                # 16 output pixels
KC = KE * KE * CIN          # 27 composed im2col width
EPS = 1e-5


# ---------------------------------------------------------------------------
# One-time host-side prep (pure numpy, outside the traced path)
# ---------------------------------------------------------------------------
def _patch_index() -> jnp.ndarray:
    """Flat gather indices: (16*27,) into flattened NHWC x of size 6*6*3."""
    idx = np.zeros((P2, KC), np.int32)
    for i in range(H2):
        for j in range(W2):
            p = i * W2 + j
            k = 0
            for kh in range(KE):
                for kw in range(KE):
                    for ci in range(CIN):
                        idx[p, k] = ((i + kh) * W + (j + kw)) * CIN + ci
                        k += 1
    return jnp.asarray(idx.reshape(-1))


_PATCH_IDX = _patch_index()


def prepare_params(w1, b1, w2, b2, gamma, beta):
    """Compose conv1∘conv2 into (Wc, bc) and pack BN params. Numpy, one-time."""
    w1 = np.asarray(w1, np.float32)     # (C1, CIN, KH, KW)
    b1 = np.asarray(b1, np.float32)     # (C1,)
    w2 = np.asarray(w2, np.float32)     # (C2, C1, KH, KW)
    b2 = np.asarray(b2, np.float32)     # (C2,)

    w1_t = np.transpose(w1, (2, 3, 1, 0))          # (KH, KW, CIN, C1)
    w2_t = np.transpose(w2, (2, 3, 1, 0))          # (KH, KW, C1,  C2)

    wc = np.zeros((KE, KE, CIN, C2), np.float32)
    bc = b2.copy()
    for kh2 in range(KH):
        for kw2 in range(KW):
            bc += b1 @ w2_t[kh2, kw2]
            for kh1 in range(KH):
                for kw1 in range(KW):
                    wc[kh1 + kh2, kw1 + kw2] += w1_t[kh1, kw1] @ w2_t[kh2, kw2]
    wc_mat = wc.reshape(KC, C2)                    # column k = (kh*KE+kw)*CIN+ci

    params = np.stack([bc,
                       np.asarray(gamma, np.float32),
                       np.asarray(beta, np.float32)], axis=0)   # (3, C2)
    return jnp.asarray(wc_mat), jnp.asarray(params)


# ---------------------------------------------------------------------------
# Pallas kernel: one matmul + fused BatchNorm epilogue
# ---------------------------------------------------------------------------
def _fused_conv_bn_kernel(p_ref, wc_ref, params_ref, out_ref):
    bc = params_ref[0:1, :]                        # (1, 5) fused bias
    gamma = params_ref[1:2, :]
    beta = params_ref[2:3, :]

    # composed conv: (16,27) @ (27,5) + bc
    t = jnp.dot(p_ref[...], wc_ref[...],
                preferred_element_type=jnp.float32) + bc         # (16, 5)

    # BatchNorm2d (training mode): biased stats over the 16 N*H*W rows,
    # affine folded into a single scale/shift.
    mean = jnp.mean(t, axis=0, keepdims=True)                    # (1, 5)
    diff = t - mean
    var = jnp.mean(diff * diff, axis=0, keepdims=True)
    scale = gamma * jax.lax.rsqrt(var + EPS)
    shift = beta - mean * scale
    out_ref[...] = t * scale + shift


_COST = pl.CostEstimate(
    flops=2 * P2 * KC * C2 + 8 * P2 * C2,
    transcendentals=C2,
    bytes_accessed=4 * (P2 * KC + KC * C2 + 3 * C2 + P2 * C2),
)

_VMEM = pl.BlockSpec(memory_space=pltpu.MemorySpace.VMEM)

_fused_call = pl.pallas_call(
    _fused_conv_bn_kernel,
    out_shape=jax.ShapeDtypeStruct((P2, C2), jnp.float32),
    in_specs=[_VMEM, _VMEM, _VMEM],
    out_specs=_VMEM,
    cost_estimate=_COST,
)


@jax.jit
def model_forward(x_nchw, wc_mat, params):
    # NCHW -> flat NHWC, then one gather builds the (16, 27) patch matrix.
    x_flat = jnp.transpose(x_nchw, (0, 2, 3, 1)).reshape(-1)     # (108,)
    patches = x_flat[_PATCH_IDX].reshape(P2, KC)                 # (16, 27)
    out_flat = _fused_call(patches, wc_mat, params)              # (16, 5)
    y_nhwc = out_flat.reshape(1, H2, W2, C2)
    return jnp.transpose(y_nhwc, (0, 3, 1, 2))                   # (1, 5, 4, 4)


# ---------------------------------------------------------------------------
# Pure-JAX reference of the same (channel-adjusted) chain
# ---------------------------------------------------------------------------
def reference(x_nchw, w1, b1, w2, b2, gamma, beta):
    x = jnp.transpose(x_nchw, (0, 2, 3, 1))
    dn = ('NHWC', 'HWIO', 'NHWC')
    s = jax.lax.conv_general_dilated(x, jnp.transpose(w1, (2, 3, 1, 0)),
                                     (1, 1), 'VALID', dimension_numbers=dn) + b1
    t = jax.lax.conv_general_dilated(s, jnp.transpose(w2, (2, 3, 1, 0)),
                                     (1, 1), 'VALID', dimension_numbers=dn) + b2
    mean = jnp.mean(t, axis=(0, 1, 2), keepdims=True)
    var = jnp.mean((t - mean) ** 2, axis=(0, 1, 2), keepdims=True)
    y = gamma * (t - mean) * jax.lax.rsqrt(var + EPS) + beta
    return jnp.transpose(y, (0, 3, 1, 2))


if __name__ == "__main__":
    key = jax.random.PRNGKey(0)
    kx, k1, k2, k3, k4 = jax.random.split(key, 5)

    # torch.rand(1, 3, 6, 6) analogue
    x = jax.random.uniform(kx, (1, CIN, H, W), jnp.float32)

    # PyTorch default Conv2d init: U(-1/sqrt(fan_in), 1/sqrt(fan_in))
    bnd1 = 1.0 / np.sqrt(CIN * KH * KW)
    w1 = jax.random.uniform(k1, (C1, CIN, KH, KW), jnp.float32, -bnd1, bnd1)
    b1 = jax.random.uniform(k2, (C1,), jnp.float32, -bnd1, bnd1)
    bnd2 = 1.0 / np.sqrt(C1 * KH * KW)
    w2 = jax.random.uniform(k3, (C2, C1, KH, KW), jnp.float32, -bnd2, bnd2)
    b2 = jax.random.uniform(k4, (C2,), jnp.float32, -bnd2, bnd2)
    # BatchNorm affine params (default init)
    gamma = jnp.ones((C2,), jnp.float32)
    beta = jnp.zeros((C2,), jnp.float32)

    # one-time host-side composition of weights
    wc_mat, params = prepare_params(w1, b1, w2, b2, gamma, beta)

    y = model_forward(x, wc_mat, params)
    y = jax.block_until_ready(y)

    y_ref = reference(x, w1, b1, w2, b2, gamma, beta)
    assert y.shape == (1, C2, H2, W2), y.shape
    np.testing.assert_allclose(np.asarray(y), np.asarray(y_ref),
                               rtol=1e-4, atol=1e-5)
    print("KERNEL_OK")
</pallas_src>

<mosaic_0001>
module attributes {stable_mosaic.version = 11 : i64} {
  func.func @_fused_conv_bn_kernel(%arg0: memref<16x27xf32, #tpu.memory_space<vmem>>, %arg1: memref<27x5xf32, #tpu.memory_space<vmem>>, %arg2: memref<3x5xf32, #tpu.memory_space<vmem>>, %arg3: memref<16x5xf32, #tpu.memory_space<vmem>>) attributes {dimension_semantics = [], scalar_prefetch = 0 : i64, scratch_operands = 0 : i64, tpu.core_type = #tpu.core_type<tc>} {
    %c0 = arith.constant 0 : index
    %c0_0 = arith.constant 0 : index
    %0 = vector.load %arg2[%c0, %c0_0] : memref<3x5xf32, #tpu.memory_space<vmem>>, vector<1x5xf32>
    %c1 = arith.constant 1 : index
    %c0_1 = arith.constant 0 : index
    %1 = vector.load %arg2[%c1, %c0_1] : memref<3x5xf32, #tpu.memory_space<vmem>>, vector<1x5xf32>
    %c2 = arith.constant 2 : index
    %c0_2 = arith.constant 0 : index
    %2 = vector.load %arg2[%c2, %c0_2] : memref<3x5xf32, #tpu.memory_space<vmem>>, vector<1x5xf32>
    %c0_3 = arith.constant 0 : index
    %c0_4 = arith.constant 0 : index
    %3 = vector.load %arg0[%c0_3, %c0_4] : memref<16x27xf32, #tpu.memory_space<vmem>>, vector<16x27xf32>
    %c0_5 = arith.constant 0 : index
    %c0_6 = arith.constant 0 : index
    %4 = vector.load %arg1[%c0_5, %c0_6] : memref<27x5xf32, #tpu.memory_space<vmem>>, vector<27x5xf32>
    %cst = arith.constant dense<0.000000e+00> : vector<16x5xf32>
    %5 = tpu.matmul %3, %4, %cst {dimension_numbers = #tpu.dot_dimension_numbers<[1], [0], [0], [1], [0, 0, 1, 1], [], []>} : vector<16x27xf32>, vector<27x5xf32>, vector<16x5xf32> -> vector<16x5xf32>
    %6 = vector.broadcast %0 : vector<1x5xf32> to vector<16x5xf32>
    %7 = arith.addf %5, %6 : vector<16x5xf32>
    %cst_7 = arith.constant dense<0.000000e+00> : vector<5xf32>
    %8 = vector.multi_reduction <add>, %7, %cst_7 [0] : vector<16x5xf32> to vector<5xf32>
    %9 = vector.shape_cast %8 : vector<5xf32> to vector<1x5xf32>
    %cst_8 = arith.constant 1.600000e+01 : f32
    %10 = vector.broadcast %cst_8 : f32 to vector<1x5xf32>
    %11 = arith.divf %9, %10 : vector<1x5xf32>
    %12 = vector.broadcast %11 : vector<1x5xf32> to vector<16x5xf32>
    %13 = arith.subf %7, %12 : vector<16x5xf32>
    %14 = arith.mulf %13, %13 : vector<16x5xf32>
    %cst_9 = arith.constant dense<0.000000e+00> : vector<5xf32>
    %15 = vector.multi_reduction <add>, %14, %cst_9 [0] : vector<16x5xf32> to vector<5xf32>
    %16 = vector.shape_cast %15 : vector<5xf32> to vector<1x5xf32>
    %cst_10 = arith.constant 1.600000e+01 : f32
    %17 = vector.broadcast %cst_10 : f32 to vector<1x5xf32>
    %18 = arith.divf %16, %17 : vector<1x5xf32>
    %cst_11 = arith.constant 9.99999974E-6 : f32
    %19 = vector.broadcast %cst_11 : f32 to vector<1x5xf32>
    %20 = arith.addf %18, %19 : vector<1x5xf32>
    %21 = math.rsqrt %20 : vector<1x5xf32>
    %22 = arith.mulf %1, %21 : vector<1x5xf32>
    %23 = arith.mulf %11, %22 : vector<1x5xf32>
    %24 = arith.subf %2, %23 : vector<1x5xf32>
    %25 = vector.broadcast %22 : vector<1x5xf32> to vector<16x5xf32>
    %26 = arith.mulf %7, %25 : vector<16x5xf32>
    %27 = vector.broadcast %24 : vector<1x5xf32> to vector<16x5xf32>
    %28 = arith.addf %26, %27 : vector<16x5xf32>
    %c0_12 = arith.constant 0 : index
    %c0_13 = arith.constant 0 : index
    %29 = vector.load %arg3[%c0_12, %c0_13] : memref<16x5xf32, #tpu.memory_space<vmem>>, vector<16x5xf32>
    tpu.vector_store %arg3[%c0_12, %c0_13], %28 {strides = array<i32>} : memref<16x5xf32, #tpu.memory_space<vmem>>, vector<16x5xf32>,
    return
  }
}

</mosaic_0001>

<bundles_post_ra>
// kernel: model_forward.1
= control target key start
LH: loop header
LB: loop body
LE: loop exit
PB: predicated region body
PF: predicated region fallthrough
CT: control target
= control target key end

     0   :  { %vm34_vm0 = vcmask 1042432   ;;  %vm27_vm1 = vcmask 220160   ;;  %vm113_vm2 = vcmask 39936   ;;  %v144_v36 = vlaneseq  ;;  %s246_s1 = inlined_call_operand.vmem [shape: f32[27,5], index: 1, kind: input, shape index: {}]   ;;  %s247_s0 = inlined_call_operand.vmem [shape: f32[16,27], index: 0, kind: input, shape index: {}]   ;;  %s248_s2 = inlined_call_operand.vmem [shape: f32[3,5], index: 2, kind: input, shape index: {}]   ;;  %s249_s3 = inlined_call_operand.vmem [shape: f32[16,5], index: 3, kind: output, shape index: {}]  }
   0x1   :  { %v22_v0 = vld [vmem:[%s246_s1 + $0x18] sm:$0x7]  ;;  %v21_v1 = vld [vmem:[%s246_s1 + $0x10] sm:$0xff]  ;;  %v17_v2 = vld [vmem:[%s247_s0] sm:$0xff] }
   0x2   :  { %172 = vmatprep.subr.msk.mxu0 %vm34_vm0, %v22_v0  ;;  %v20_v3 = vld [vmem:[%s246_s1 + $0x8] sm:$0xff]  ;;  %180 = vmatprep.mubr.msk.f32.mxu0 %vm27_vm1, %v17_v2  ;;  %v19_v4 = vld [vmem:[%s246_s1] sm:$0xff]  ;;  %v145_v37 = vshrl.u32 %v144_v36, 7 }
   0x3   :  { %173 = vmatpush3.msk.msra.mxu0 %vm34_vm0, %v22_v0  ;;  %v18_v5 = vld [vmem:[%s247_s0 + $0x8] sm:$0xff]  ;;  %v162_v6 = vld [vmem:[%s248_s2] ss:$0 sm:$0xff]  ;;  %v15_v38 = vld [vmem:[%s248_s2 + $0x1] sm:$0x1] }
   0x4   :  { %174 = vmatprep.subr.mxu0 %v21_v1  ;;  %v146_v39 = vsub.s32 0, %v145_v37  ;;  %v16_v42 = vld [vmem:[%s248_s2 + $0x2] sm:$0x1] }
   0x5   :  { %175 = vmatpush3.msra.mxu0 %v21_v1 }
   0x6   :  { %176 = vmatprep.subr.mxu0 %v20_v3 }
   0x7   :  { %177 = vmatpush3.msra.mxu0 %v20_v3 }
   0x8   :  { %178 = vmatprep.subr.mxu0 %v19_v4 }
   0x9   :  { %179 = vmatpush3.msra.mxu0 %v19_v4 }
   0xa   :  { %181 = vmatmul.mubr.msk.f32.vlgmr.msra.gmra.mxu0 %vm27_vm1, %v18_v5 }
  0xca   :  { %v182_v7 = vpop.f32.mrf.mxu0 }
  0xcb   :  { %v110_v8 = vadd.f32 %v182_v7, %v162_v6 }
  0xcc   :  { %v104_v9 = vpop.f32.mrf.mxu0 }
  0xcd   :  { %v105_v10 = vadd.f32 %v162_v6, %v104_v9  ;;  %v115_v11 = vsel %vm113_vm2, %v110_v8, 0.0 }
  0xcf   :  { %v114_v12 = vsel %vm113_vm2, %v105_v10, 0.0 }
  0xd0   :  { %v116_v13 = vadd.f32 %v115_v11, %v114_v12 }
  0xd2   :  { %v117_v14 = vrot.slane %v116_v13, 4 }
  0xd4   :  { %v118_v15 = vadd.f32 %v117_v14, %v116_v13 }
  0xd6   :  { %v119_v16 = vrot.slane %v118_v15, 2 }
  0xd8   :  { %v120_v17 = vadd.f32 %v119_v16, %v118_v15 }
  0xda   :  { %v121_v18 = vrot.slane %v120_v17, 1 }
  0xdc   :  { %v122_v19 = vadd.f32 %v121_v18, %v120_v17 }
  0xde   :  { %v124_v20 = vmul.f32 0.0625, %v122_v19 }
  0xe0   :  { %v125_v21 = vsub.f32 %v105_v10, %v124_v20  ;;  %v126_v22 = vsub.f32 %v110_v8, %v124_v20 }
  0xe2   :  { %v127_v23 = vmul.f32 %v125_v21, %v125_v21  ;;  %v128_v24 = vmul.f32 %v126_v22, %v126_v22 }
  0xe4   :  { %v129_v25 = vsel %vm113_vm2, %v127_v23, 0.0  ;;  %v130_v26 = vsel %vm113_vm2, %v128_v24, 0.0 }
  0xe5   :  { %v131_v27 = vadd.f32 %v130_v26, %v129_v25 }
  0xe7   :  { %v132_v28 = vrot.slane %v131_v27, 4 }
  0xe9   :  { %v133_v29 = vadd.f32 %v132_v28, %v131_v27 }
  0xeb   :  { %v134_v30 = vrot.slane %v133_v29, 2 }
  0xed   :  { %v135_v31 = vadd.f32 %v134_v30, %v133_v29 }
  0xef   :  { %v136_v32 = vrot.slane %v135_v31, 1 }
  0xf1   :  { %v137_v33 = vadd.f32 %v136_v32, %v135_v31 }
  0xf3   :  { %v138_v34 = vmul.f32 0.0625, %v137_v33 }
  0xf5   :  { %v139_v35 = vadd.f32 1e-05, %v138_v34 }
  0xf7   :  { %183 = vrsqrt.f32 %v139_v35 }
 0x104   :  { %v184_v40 = vpop.eup %183 }
 0x105   :  { %v141_v41 = vmul.f32 %v184_v40, %v15_v38 }
 0x107   :  { %v142_v43 = vmul.f32 %v141_v41, %v124_v20  ;;  %v147_v44 = vrot.slane %v141_v41, %v146_v39 }
 0x109   :  { %v143_v45 = vsub.f32 %v16_v42, %v142_v43  ;;  %v148_v46 = vmul.f32 %v147_v44, %v105_v10  ;;  %v149_v47 = vmul.f32 %v147_v44, %v110_v8 }
 0x10b   :  { %v153_v48 = vrot.slane %v143_v45, %v146_v39 }
 0x10d   :  { %v154_v49 = vadd.f32 %v153_v48, %v148_v46  ;;  %v155_v50 = vadd.f32 %v153_v48, %v149_v47 }
 0x10f   :  { %156 = vst.msk [vmem:[%s249_s3] sm:$0xff] %vm113_vm2, %v154_v49  ;;  %157 = vst.msk [vmem:[%s249_s3 + $0x8] sm:$0xff] %vm113_vm2, %v155_v50 }

</bundles_post_ra>
